<compile_context>
chip_gen: v6e
topology: v6e:2x2x1
jax: 0.10.0
libtpu: 0.0.40
codegen_flags: <defaults>
</compile_context>

<pallas_src>
import jax
import jax.numpy as jnp
from jax.experimental import pallas as pl
from jax.experimental.pallas import tpu as pltpu


def _cdiv(a, b):
    return (a + b - 1) // b


def _round_down_128(x):
    return max(128, (x // 128) * 128)


def outconv_kernel(x_ref, w_ref, b_ref, o_ref):
    # x_ref: (bn, C_in, tn)   w_ref: (C_out, C_in)   b_ref: (C_out, 1)
    # o_ref: (bn, C_out, tn)
    w = w_ref[...]
    b = b_ref[...]
    for i in range(x_ref.shape[0]):            # bn is small & static -> unrolled
        acc = jnp.dot(w, x_ref[i], preferred_element_type=jnp.float32)
        o_ref[i] = (acc + b).astype(o_ref.dtype)


def _select_tiles(N, C_in, C_out, HW, itemsize, *,
                  vmem_budget_bytes, max_tn, min_tn, min_grid_blocks):
    """Pick (bn, tn): batch-block and lane-tile sizes.

    tn is either a multiple of 128 (edge block masked by Pallas) or the full
    spatial extent HW (always legal). bn > 1 only when one spatial tile covers
    the whole image, to amortize per-grid-step overhead on small images.
    """
    per_lane = 2 * (C_in + C_out) * itemsize          # double-buffered in + out
    tn_budget = _round_down_128(min(max_tn, vmem_budget_bytes // per_lane))

    want_j = _cdiv(min_grid_blocks, max(N, 1))        # spatial blocks wanted (megacore)

    if tn_budget >= HW:
        # Whole image fits in one lane tile.
        if want_j > 1 and HW >= want_j * min_tn:
            tn = _round_down_128(_cdiv(HW, want_j))   # split so both TCs get work
        else:
            tn = HW                                   # full-extent block: always legal
    else:
        tn = tn_budget                                # multiple of 128
        if _cdiv(HW, tn) < want_j and HW >= want_j * min_tn:
            tn = max(min_tn, _round_down_128(_cdiv(HW, want_j)))

    # Small images: pack several images per block (~1 MiB of x per block target).
    bn = 1
    if tn >= HW and N > 1:
        per_image = 2 * (C_in + C_out) * tn * itemsize          # double-buffered
        bn_budget = max(1, vmem_budget_bytes // per_image)
        bn_target = max(1, (1 << 20) // max(1, C_in * tn * itemsize))
        bn = int(min(N, bn_budget, bn_target))
    return bn, tn


def out_conv(x_nchw, weight, bias, *, tn=None, bn=None,
             vmem_budget_bytes=12 << 20, max_tn=128 * 1024,
             min_tn=4096, min_grid_blocks=8):
    """1x1 conv (nn.Conv2d(in_ch, out_ch, kernel_size=1)) forward.

    x_nchw: (N, C_in, H, W)
    weight: (C_out, C_in, 1, 1)   (PyTorch layout)
    bias:   (C_out,)
    returns: (N, C_out, H, W)
    """
    N, C_in, H, W = x_nchw.shape
    C_out = weight.shape[0]
    HW = H * W
    itemsize = jnp.dtype(x_nchw.dtype).itemsize

    auto_bn, auto_tn = _select_tiles(
        N, C_in, C_out, HW, itemsize,
        vmem_budget_bytes=vmem_budget_bytes, max_tn=max_tn,
        min_tn=min_tn, min_grid_blocks=min_grid_blocks)
    if tn is None:
        tn = auto_tn
    if bn is None:
        bn = auto_bn

    # Pure reshapes (no transpose, no pad) — contiguous, essentially free.
    x3 = x_nchw.reshape(N, C_in, HW)               # channels on sublanes, spatial on lanes
    w_mat = weight.reshape(C_out, C_in).astype(x_nchw.dtype)
    b_mat = bias.reshape(C_out, 1).astype(jnp.float32)   # broadcasts over the lane dim

    grid = (_cdiv(N, bn), _cdiv(HW, tn))

    out3 = pl.pallas_call(
        outconv_kernel,
        out_shape=jax.ShapeDtypeStruct((N, C_out, HW), x_nchw.dtype),
        grid_spec=pltpu.PrefetchScalarGridSpec(
            num_scalar_prefetch=0,
            grid=grid,
            in_specs=[
                # Spatial tile of bn images; channel dim is the full (small) extent.
                pl.BlockSpec((bn, C_in, tn), lambda i, j: (i, 0, j)),
                # Weight / bias are tiny: full-extent blocks, resident across the grid.
                pl.BlockSpec((C_out, C_in), lambda i, j: (0, 0)),
                pl.BlockSpec((C_out, 1), lambda i, j: (0, 0)),
            ],
            out_specs=pl.BlockSpec((bn, C_out, tn), lambda i, j: (i, 0, j)),
        ),
        compiler_params=pltpu.CompilerParams(
            dimension_semantics=("parallel", "parallel"),
        ),
    )(x3, w_mat, b_mat)

    return out3.reshape(N, C_out, H, W)


if __name__ == "__main__":
    key = jax.random.PRNGKey(0)
    kx, kw, kb = jax.random.split(key, 3)

    N, C_in, C_out, Hh, Ww = 2, 4, 3, 16, 16

    x = jax.random.normal(kx, (N, C_in, Hh, Ww), dtype=jnp.float32)
    # Deterministic synthetic parameters (shapes match nn.Conv2d(C_in, C_out, 1)).
    weight = jax.random.normal(kw, (C_out, C_in, 1, 1), dtype=jnp.float32) * 0.1
    bias = jax.random.normal(kb, (C_out,), dtype=jnp.float32) * 0.1

    def ref_fn(xx, ww, bb):
        return (jnp.einsum("nchw,oc->nohw", xx, ww.reshape(ww.shape[0], ww.shape[1]))
                + bb[None, :, None, None])

    # Main case (auto tiling: whole image in one lane tile, batch-packed).
    out = jax.block_until_ready(out_conv(x, weight, bias))
    ref = ref_fn(x, weight, bias)
    assert out.shape == (N, C_out, Hh, Ww)
    assert jnp.allclose(out, ref, atol=1e-5, rtol=1e-5)

    # Robustness case: non-128-divisible H*W with forced small tiles so the
    # cdiv grid / masked-edge-block path and partial batch blocks are exercised.
    N2, H2, W2 = 3, 10, 13
    x2 = jax.random.normal(kx, (N2, C_in, H2, W2), dtype=jnp.float32)
    out2 = jax.block_until_ready(out_conv(x2, weight, bias, tn=128, bn=2))
    ref2 = ref_fn(x2, weight, bias)
    assert out2.shape == (N2, C_out, H2, W2)
    assert jnp.allclose(out2, ref2, atol=1e-5, rtol=1e-5)

    print("KERNEL_OK")
</pallas_src>

<mosaic_0001>
module attributes {stable_mosaic.version = 11 : i64} {
  func.func @outconv_kernel(%arg0: i32, %arg1: i32, %arg2: memref<2x4x256xf32, #tpu.memory_space<vmem>>, %arg3: memref<3x4xf32, #tpu.memory_space<vmem>>, %arg4: memref<3x1xf32, #tpu.memory_space<vmem>>, %arg5: memref<2x3x256xf32, #tpu.memory_space<vmem>>) attributes {dimension_semantics = [#tpu.dimension_semantics<parallel>, #tpu.dimension_semantics<parallel>], iteration_bounds = array<i64: 1, 1>, scalar_prefetch = 0 : i64, scratch_operands = 0 : i64, tpu.core_type = #tpu.core_type<tc>, window_params = [{transform_indices = @transform_0, window_bounds = array<i64: 2, 4, 256>}, {pipeline_mode = #tpu.pipeline_mode<synchronous>, transform_indices = @transform_1, window_bounds = array<i64: 3, 4>}, {pipeline_mode = #tpu.pipeline_mode<synchronous>, transform_indices = @transform_2, window_bounds = array<i64: 3, 1>}, {transform_indices = @transform_3, window_bounds = array<i64: 2, 3, 256>}]} {
    %c0 = arith.constant 0 : index
    %c0_0 = arith.constant 0 : index
    %0 = vector.load %arg3[%c0, %c0_0] : memref<3x4xf32, #tpu.memory_space<vmem>>, vector<3x4xf32>
    %c0_1 = arith.constant 0 : index
    %c0_2 = arith.constant 0 : index
    %1 = vector.load %arg4[%c0_1, %c0_2] : memref<3x1xf32, #tpu.memory_space<vmem>>, vector<3x1xf32>
    %c0_3 = arith.constant 0 : index
    %c0_4 = arith.constant 0 : index
    %c0_5 = arith.constant 0 : index
    %2 = vector.load %arg2[%c0_3, %c0_4, %c0_5] : memref<2x4x256xf32, #tpu.memory_space<vmem>>, vector<1x4x256xf32>
    %3 = vector.shape_cast %2 : vector<1x4x256xf32> to vector<4x256xf32>
    %cst = arith.constant dense<0.000000e+00> : vector<3x256xf32>
    %4 = tpu.matmul %0, %3, %cst {dimension_numbers = #tpu.dot_dimension_numbers<[1], [0], [0], [1], [0, 0, 1, 1], [], []>} : vector<3x4xf32>, vector<4x256xf32>, vector<3x256xf32> -> vector<3x256xf32>
    %5 = vector.broadcast %1 : vector<3x1xf32> to vector<3x256xf32>
    %6 = arith.addf %4, %5 : vector<3x256xf32>
    %c0_6 = arith.constant 0 : index
    %c0_7 = arith.constant 0 : index
    %c0_8 = arith.constant 0 : index
    %7 = vector.load %arg5[%c0_6, %c0_7, %c0_8] : memref<2x3x256xf32, #tpu.memory_space<vmem>>, vector<1x3x256xf32>
    %8 = vector.shape_cast %7 : vector<1x3x256xf32> to vector<3x256xf32>
    %9 = vector.shape_cast %6 : vector<3x256xf32> to vector<1x3x256xf32>
    tpu.vector_store %arg5[%c0_6, %c0_7, %c0_8], %9 {strides = array<i32>} : memref<2x3x256xf32, #tpu.memory_space<vmem>>, vector<1x3x256xf32>,
    %c1 = arith.constant 1 : index
    %c0_9 = arith.constant 0 : index
    %c0_10 = arith.constant 0 : index
    %10 = vector.load %arg2[%c1, %c0_9, %c0_10] : memref<2x4x256xf32, #tpu.memory_space<vmem>>, vector<1x4x256xf32>
    %11 = vector.shape_cast %10 : vector<1x4x256xf32> to vector<4x256xf32>
    %cst_11 = arith.constant dense<0.000000e+00> : vector<3x256xf32>
    %12 = tpu.matmul %0, %11, %cst_11 {dimension_numbers = #tpu.dot_dimension_numbers<[1], [0], [0], [1], [0, 0, 1, 1], [], []>} : vector<3x4xf32>, vector<4x256xf32>, vector<3x256xf32> -> vector<3x256xf32>
    %13 = vector.broadcast %1 : vector<3x1xf32> to vector<3x256xf32>
    %14 = arith.addf %12, %13 : vector<3x256xf32>
    %c1_12 = arith.constant 1 : index
    %c0_13 = arith.constant 0 : index
    %c0_14 = arith.constant 0 : index
    %15 = vector.load %arg5[%c1_12, %c0_13, %c0_14] : memref<2x3x256xf32, #tpu.memory_space<vmem>>, vector<1x3x256xf32>
    %16 = vector.shape_cast %15 : vector<1x3x256xf32> to vector<3x256xf32>
    %17 = vector.shape_cast %14 : vector<3x256xf32> to vector<1x3x256xf32>
    tpu.vector_store %arg5[%c1_12, %c0_13, %c0_14], %17 {strides = array<i32>} : memref<2x3x256xf32, #tpu.memory_space<vmem>>, vector<1x3x256xf32>,
    return
  }
  func.func @transform_0(%arg0: i32, %arg1: i32) -> (i32, i32, i32) {
    %c0_i32 = arith.constant 0 : i32
    %c0_i32_0 = arith.constant 0 : i32
    return %arg0, %c0_i32, %arg1 : i32, i32, i32
  }
  func.func @transform_1(%arg0: i32, %arg1: i32) -> (i32, i32) {
    %c0_i32 = arith.constant 0 : i32
    %c0_i32_0 = arith.constant 0 : i32
    %c0_i32_1 = arith.constant 0 : i32
    return %c0_i32, %c0_i32_0 : i32, i32
  }
  func.func @transform_2(%arg0: i32, %arg1: i32) -> (i32, i32) {
    %c0_i32 = arith.constant 0 : i32
    %c0_i32_0 = arith.constant 0 : i32
    %c0_i32_1 = arith.constant 0 : i32
    return %c0_i32, %c0_i32_0 : i32, i32
  }
  func.func @transform_3(%arg0: i32, %arg1: i32) -> (i32, i32, i32) {
    %c0_i32 = arith.constant 0 : i32
    %c0_i32_0 = arith.constant 0 : i32
    return %arg0, %c0_i32, %arg1 : i32, i32, i32
  }
}

</mosaic_0001>

<bundles_post_ra>
// kernel: tpu_custom_call.1
= control target key start
LH: loop header
LB: loop body
LE: loop exit
PB: predicated region body
PF: predicated region fallthrough
CT: control target
= control target key end

     0   :  { %8 = vsyncpa [#allocation3], 0  ;;  %s250_s12 = smov [#allocation2]   ;;  %s290_s0 = inlined_call_operand.hbm [shape: f32[2,4,256], index: 0, kind: input, shape index: {}]   ;;  %s291_s1 = inlined_call_operand.vmem [shape: f32[3,4], index: 1, kind: input, shape index: {}]   ;;  %s292_s2 = inlined_call_operand.vmem [shape: f32[3,1], index: 2, kind: input, shape index: {}]   ;;  %s293_s3 = inlined_call_operand.vmem [shape: f32[2,3,256], index: 3, kind: output, shape index: {}]  }
   0x1   :  { %s14_s13 = sshll.u32 %s250_s12, 4  ;;  %s15_s13 = int_to_ptr.vmem [resolvable:$true] %s14_s13 }
   0x2   :  { %s236_s14 = scalar_lea.vmem %s15_s13, 256  ;;  %p241_p1 = scmp.lt.s32.totalorder %s15_s13, %s15_s13 }
   0x3   :  { %p237_p0 = scmp.ne.s32.totalorder %s15_s13, %s236_s14  ;;  %p242_p2 = scmp.lt.s32.totalorder %s236_s14, %s236_s14 }
   0x5   :  { %p243_p3 = por %p242_p2, %p241_p1 }
   0x7   :  { %p244_p4 = pnand %p243_p3, %p237_p0 }
   0x9   :  { %247 = shalt.err (!%p244_p4)
}
   0xa   :  { %s251_s15 = smov 128   ;;  %s252_s16 = smov 8  }
   0xb   :  { %20 = dma.hbm_to_vmem [thread:$0]  %s290_s0, 256, %s15_s13, [#allocation3], %s251_s15, %s251_s15, %s252_s16  }
   0xc   :  { %248 = dma.done.wait [#allocation3], 256  }
   0xd   :  { %249 = vsyncadd [#allocation3], 4294967040  ;;  %v253_v0 = vmov 0.0   ;;  %v254_v1 = vmov 0   ;;  %v30_v2 = vld [vmem:[#allocation2] sm:$0xff]  ;;  %vm42_vm0 = vcmask 1043456  }
   0xe   :  { %111 = vmatprep.mubr.f32.mxu0 %v253_v0  ;;  %195 = vmatprep.mubr.f32.mxu1 %v253_v0  ;;  %v124_v3 = vld [vmem:[#allocation2 + $0x8] sm:$0xff]  ;;  %v37_v4 = vcombine.high %v30_v2, %v30_v2  ;;  %v29_v6 = vld [vmem:[%s292_s2] sm:$0x7]  ;;  %vm38_vm1 = vcmask 31744  }
   0xf   :  { %225 = vset.pattern.permute.xlu0 %v254_v1  ;;  %v126_v5 = vcombine.high %v124_v3, %v124_v3  ;;  %v28_v7 = vld [vmem:[%s291_s1] sm:$0x7] }
  0x10   :  { %33 = vperm.xlu0 %225, %v29_v6   ;;  %213 = vmatprep.subr.msk.mxu0 %vm42_vm0, %v37_v4 }
  0x11   :  { %216 = vmatprep.subr.msk.mxu1 %vm42_vm0, %v126_v5  ;;  %214 = vmatpush1.msk.msra.mxu0 %vm42_vm0, %v30_v2 }
  0x12   :  { %217 = vmatpush1.msk.msra.mxu1 %vm42_vm0, %v124_v3  ;;  %215 = vmatmul.mubr.msk.f32.vlgmr.msra.gmra.mxu0 %vm38_vm1, %v28_v7 }
  0x13   :  { %218 = vmatmul.mubr.msk.f32.vlgmr.msra.gmra.mxu1 %vm38_vm1, %v28_v7 }
  0x8b   :  { %v34_v8 = vpop.permute.xlu0 %33 }
  0xd2   :  { %v113_v9 = vpop.f32.mrf.mxu0 }
  0xd3   :  { %v197_v10 = vpop.f32.mrf.mxu1  ;;  %v114_v13 = vadd.f32 %v113_v9, %v34_v8 }
  0xd4   :  { %v115_v11 = vpop.f32.mrf.mxu0  ;;  %v198_v14 = vadd.f32 %v197_v10, %v34_v8 }
  0xd5   :  { %v199_v12 = vpop.f32.mrf.mxu1  ;;  %v116_v15 = vadd.f32 %v115_v11, %v34_v8 }
  0xd6   :  { %v200_v16 = vadd.f32 %v199_v12, %v34_v8 }
  0xd7   :  { %v120_v17 = vcombine.low %v114_v13, %v116_v15 }
  0xd8   :  { %v204_v18 = vcombine.low %v198_v14, %v200_v16 }
  0xd9   :  { %122 = vst [vmem:[%s293_s3] sm:$0x77] %v120_v17 }
  0xda   :  { %219 = vst [vmem:[%s293_s3 + $0x8] sm:$0x77] %v204_v18 }
  0xdb   :  { %212 = vsyncpa [#allocation3], 1 }

</bundles_post_ra>
